<compile_context>
chip_gen: v5e
topology: v5e:2x2
jax: 0.10.0
libtpu: 0.0.40
codegen_flags: <defaults>
</compile_context>

<pallas_src>
import functools

import numpy as np

import jax
import jax.numpy as jnp
from jax.experimental import pallas as pl
from jax.experimental.pallas import tpu as pltpu


# ------------------------------ Pallas kernel -------------------------------


def _fused_conv_bn_relu_kernel(x_ref, wb_ref, gamma_ref, beta_ref, sel_ref,
                               selt_ref, o_ref, *, kh_sz, stride, oh, eps,
                               inv_count):
    """Fused conv + train-mode BatchNorm + ReLU.

    x_ref:    (N, Hp, Wp*Cin)        zero-padded input, Cin folded into lanes
    wb_ref:   (KH, Wp*Cin, OW*Cout)  banded conv weights (one band per kh)
    gamma_ref/beta_ref: (1, Cout)
    sel_ref:  (OW*Cout, Cout)        0/1 lane->channel selector
    selt_ref: (Cout, OW*Cout)        its transpose (channel->lane broadcast)
    o_ref:    (N*OH, OW*Cout)        lane-dense output
    """
    n, _, wc = x_ref.shape
    x = x_ref[...]

    # ---- conv: KH canonical MXU matmuls accumulated in f32 -----------------
    y = None
    for kh in range(kh_sz):
        if stride == 1:
            slab = x[:, kh:kh + oh, :]
        else:
            slab = x[:, kh:kh + (oh - 1) * stride + 1:stride, :]
        a = slab.reshape(n * oh, wc)                  # leading-dim merge, cheap
        part = jnp.dot(a, wb_ref[kh], preferred_element_type=jnp.float32)
        y = part if y is None else y + part           # (N*OH, OW*Cout) f32

    # ---- train-mode BatchNorm: biased batch stats over N*OH*OW -------------
    # Channel o lives at lanes {j*Cout + o}; reduce / broadcast across lanes
    # via tiny 0/1 selector matmuls instead of lane reshapes.
    sel = sel_ref[...]                                 # (L, Cout)
    selt = selt_ref[...]                               # (Cout, L)
    colsum = jnp.sum(y, axis=0, keepdims=True)         # (1, L) sublane reduce
    mean_c = jnp.dot(colsum, sel,
                     preferred_element_type=jnp.float32) * inv_count  # (1, C)
    mean_l = jnp.dot(mean_c, selt,
                     preferred_element_type=jnp.float32)              # (1, L)
    yc = y - mean_l                                    # two-pass (safe) var
    var_c = jnp.dot(jnp.sum(yc * yc, axis=0, keepdims=True), sel,
                    preferred_element_type=jnp.float32) * inv_count   # (1, C)
    scale_c = gamma_ref[...] * jax.lax.rsqrt(var_c + eps)             # EUP
    bias_c = beta_ref[...] - mean_c * scale_c
    scale_l = jnp.dot(scale_c, selt, preferred_element_type=jnp.float32)
    bias_l = jnp.dot(bias_c, selt, preferred_element_type=jnp.float32)

    # ---- fused affine + ReLU, unmasked lane-dense store ---------------------
    o_ref[...] = jnp.maximum(y * scale_l + bias_l, 0.0).astype(o_ref.dtype)


# ------------------------------- host wrapper --------------------------------


def basic_conv2d(x_nchw, weight_oihw, gamma, beta, *, stride=1, padding=0,
                 eps=1e-5, conv_dtype=jnp.bfloat16):
    """BasicConv2d forward (train-mode BN), NCHW in / NCHW out."""
    n, cin, h, w = x_nchw.shape
    cout, _, kh, kw = weight_oihw.shape
    oh = (h + 2 * padding - kh) // stride + 1
    ow = (w + 2 * padding - kw) // stride + 1
    hp, wp = h + 2 * padding, w + 2 * padding
    wc = wp * cin                 # contraction depth of each banded matmul
    lanes = ow * cout             # output lane extent (= 128 here)

    # NCHW -> (N, Hp, Wp*Cin): channels folded into the lane axis so the input
    # tile is lane-dense.  bf16 halves the x DMA; accumulation stays f32.
    x = jnp.transpose(x_nchw, (0, 2, 3, 1))
    x = jnp.pad(x, ((0, 0), (padding, padding), (padding, padding), (0, 0)))
    x = x.reshape(n, hp, wc).astype(conv_dtype)

    # Banded weights, one (Wp*Cin, OW*Cout) band per kernel row kh:
    #   B[kh, w*Cin + c, j*Cout + o] = weight[o, c, kh, w - j*stride]
    # (zero off the band), so A_kh @ B_kh is exactly conv restricted to kernel
    # row kh, already in the lane-dense (rows, OW*Cout) output layout.
    place = np.zeros((kw, ow, wp), dtype=np.float32)
    for kk in range(kw):
        for j in range(ow):
            place[kk, j, j * stride + kk] = 1.0
    wband = jnp.einsum("kjw,ocak->awcjo", jnp.asarray(place),
                       weight_oihw.astype(jnp.float32))
    wband = wband.reshape(kh, wc, lanes).astype(conv_dtype)

    # 0/1 selectors for the BN lane<->channel reduce / broadcast matmuls.
    lane_ids = np.arange(lanes)
    sel_np = (lane_ids[:, None] % cout ==
              np.arange(cout)[None, :]).astype(np.float32)
    sel = jnp.asarray(sel_np)                 # (lanes, cout)
    selt = jnp.asarray(np.ascontiguousarray(sel_np.T))   # (cout, lanes)

    gamma2 = gamma.astype(jnp.float32).reshape(1, cout)
    beta2 = beta.astype(jnp.float32).reshape(1, cout)

    kernel = functools.partial(_fused_conv_bn_relu_kernel, kh_sz=kh,
                               stride=stride, oh=oh, eps=eps,
                               inv_count=1.0 / float(n * oh * ow))

    itemsize = jnp.dtype(conv_dtype).itemsize
    flops = 2 * kh * (n * oh) * wc * lanes          # banded-matmul flops
    bytes_accessed = ((n * hp * wc + kh * wc * lanes) * itemsize
                      + (2 * lanes * cout + 2 * cout) * 4
                      + n * oh * lanes * 4)

    out2d = pl.pallas_call(
        kernel,
        out_shape=jax.ShapeDtypeStruct((n * oh, lanes), jnp.float32),
        grid=(1,),
        in_specs=[
            pl.BlockSpec((n, hp, wc), lambda i: (0, 0, 0)),
            pl.BlockSpec((kh, wc, lanes), lambda i: (0, 0, 0)),
            pl.BlockSpec((1, cout), lambda i: (0, 0)),
            pl.BlockSpec((1, cout), lambda i: (0, 0)),
            pl.BlockSpec((lanes, cout), lambda i: (0, 0)),
            pl.BlockSpec((cout, lanes), lambda i: (0, 0)),
        ],
        out_specs=pl.BlockSpec((n * oh, lanes), lambda i: (0, 0)),
        compiler_params=pltpu.CompilerParams(
            dimension_semantics=("arbitrary",),
            vmem_limit_bytes=32 * 1024 * 1024),
        cost_estimate=pl.CostEstimate(flops=flops, transcendentals=cout,
                                      bytes_accessed=bytes_accessed),
    )(x, wband, gamma2, beta2, sel, selt)

    # (N*OH, OW*Cout) -> (N, Cout, OH, OW).  Model-boundary layout conversion.
    return jnp.transpose(out2d.reshape(n, oh, ow, cout), (0, 3, 1, 2))


# -------------------------------- reference ----------------------------------


def _reference(x_nchw, weight_oihw, gamma, beta, *, stride, padding, eps=1e-5):
    y = jax.lax.conv_general_dilated(
        x_nchw.astype(jnp.float32), weight_oihw.astype(jnp.float32),
        window_strides=(stride, stride),
        padding=[(padding, padding), (padding, padding)],
        dimension_numbers=("NCHW", "OIHW", "NCHW"),
        precision=jax.lax.Precision.HIGHEST)
    mean = jnp.mean(y, axis=(0, 2, 3), keepdims=True)
    var = jnp.mean(jnp.square(y - mean), axis=(0, 2, 3), keepdims=True)
    yn = (y - mean) / jnp.sqrt(var + eps)
    yn = yn * gamma.reshape(1, -1, 1, 1) + beta.reshape(1, -1, 1, 1)
    return jnp.maximum(yn, 0.0)


# ----------------------------------- main -------------------------------------


if __name__ == "__main__":
    # BasicConv2d(in_planes=4, out_planes=8, kernel_size=3, stride=1, padding=1)
    N, CIN, H, W = 2, 4, 16, 16
    COUT, K, STRIDE, PAD = 8, 3, 1, 1

    key = jax.random.PRNGKey(0)
    kx, kw_key = jax.random.split(key)
    x = jax.random.normal(kx, (N, CIN, H, W), dtype=jnp.float32)
    weight = jax.random.normal(kw_key, (COUT, CIN, K, K), dtype=jnp.float32) * 0.1
    # BatchNorm2d default affine parameters: gamma=1, beta=0.
    gamma = jnp.ones((COUT,), dtype=jnp.float32)
    beta = jnp.zeros((COUT,), dtype=jnp.float32)

    out = basic_conv2d(x, weight, gamma, beta, stride=STRIDE, padding=PAD)
    out = jax.block_until_ready(out)

    ref = jax.block_until_ready(
        _reference(x, weight, gamma, beta, stride=STRIDE, padding=PAD))

    assert out.shape == (N, COUT, H, W), out.shape
    # bf16 matmul inputs (f32 accumulation/BN) vs f32 reference -> loosened tol.
    max_err = float(jnp.max(jnp.abs(out - ref)))
    assert jnp.allclose(out, ref, atol=3e-2, rtol=3e-2), max_err
    print("KERNEL_OK")
</pallas_src>

<mosaic_0001>
module attributes {stable_mosaic.version = 11 : i64} {
  func.func @_fused_conv_bn_relu_kernel(%arg0: i32, %arg1: memref<2x18x72xbf16, #tpu.memory_space<vmem>>, %arg2: memref<3x72x128xbf16, #tpu.memory_space<vmem>>, %arg3: memref<1x8xf32, #tpu.memory_space<vmem>>, %arg4: memref<1x8xf32, #tpu.memory_space<vmem>>, %arg5: memref<128x8xf32, #tpu.memory_space<vmem>>, %arg6: memref<8x128xf32, #tpu.memory_space<vmem>>, %arg7: memref<32x128xf32, #tpu.memory_space<vmem>>) attributes {dimension_semantics = [#tpu.dimension_semantics<arbitrary>], iteration_bounds = array<i64: 1>, scalar_prefetch = 0 : i64, scratch_operands = 0 : i64, tpu.core_type = #tpu.core_type<tc>, window_params = [{pipeline_mode = #tpu.pipeline_mode<synchronous>, transform_indices = @transform_0, window_bounds = array<i64: 2, 18, 72>}, {pipeline_mode = #tpu.pipeline_mode<synchronous>, transform_indices = @transform_1, window_bounds = array<i64: 3, 72, 128>}, {pipeline_mode = #tpu.pipeline_mode<synchronous>, transform_indices = @transform_2, window_bounds = array<i64: 1, 8>}, {pipeline_mode = #tpu.pipeline_mode<synchronous>, transform_indices = @transform_3, window_bounds = array<i64: 1, 8>}, {pipeline_mode = #tpu.pipeline_mode<synchronous>, transform_indices = @transform_4, window_bounds = array<i64: 128, 8>}, {pipeline_mode = #tpu.pipeline_mode<synchronous>, transform_indices = @transform_5, window_bounds = array<i64: 8, 128>}, {pipeline_mode = #tpu.pipeline_mode<synchronous>, transform_indices = @transform_6, window_bounds = array<i64: 32, 128>}]} {
    %c0 = arith.constant 0 : index
    %c0_0 = arith.constant 0 : index
    %c0_1 = arith.constant 0 : index
    %0 = vector.load %arg1[%c0, %c0_0, %c0_1] : memref<2x18x72xbf16, #tpu.memory_space<vmem>>, vector<2x18x72xbf16>
    %1 = vector.extract_strided_slice %0 {offsets = [0, 0, 0], sizes = [2, 16, 72], strides = [1, 1, 1]} : vector<2x18x72xbf16> to vector<2x16x72xbf16>
    %2 = vector.shape_cast %1 : vector<2x16x72xbf16> to vector<32x72xbf16>
    %c0_2 = arith.constant 0 : index
    %c0_3 = arith.constant 0 : index
    %c0_4 = arith.constant 0 : index
    %3 = vector.load %arg2[%c0_2, %c0_3, %c0_4] : memref<3x72x128xbf16, #tpu.memory_space<vmem>>, vector<1x72x128xbf16>
    %4 = vector.shape_cast %3 : vector<1x72x128xbf16> to vector<72x128xbf16>
    %cst = arith.constant dense<0.000000e+00> : vector<32x128xf32>
    %5 = tpu.matmul %2, %4, %cst {dimension_numbers = #tpu.dot_dimension_numbers<[1], [0], [0], [1], [0, 0, 1, 1], [], []>} : vector<32x72xbf16>, vector<72x128xbf16>, vector<32x128xf32> -> vector<32x128xf32>
    %6 = vector.extract_strided_slice %0 {offsets = [0, 1, 0], sizes = [2, 16, 72], strides = [1, 1, 1]} : vector<2x18x72xbf16> to vector<2x16x72xbf16>
    %7 = vector.shape_cast %6 : vector<2x16x72xbf16> to vector<32x72xbf16>
    %c1 = arith.constant 1 : index
    %c0_5 = arith.constant 0 : index
    %c0_6 = arith.constant 0 : index
    %8 = vector.load %arg2[%c1, %c0_5, %c0_6] : memref<3x72x128xbf16, #tpu.memory_space<vmem>>, vector<1x72x128xbf16>
    %9 = vector.shape_cast %8 : vector<1x72x128xbf16> to vector<72x128xbf16>
    %cst_7 = arith.constant dense<0.000000e+00> : vector<32x128xf32>
    %10 = tpu.matmul %7, %9, %cst_7 {dimension_numbers = #tpu.dot_dimension_numbers<[1], [0], [0], [1], [0, 0, 1, 1], [], []>} : vector<32x72xbf16>, vector<72x128xbf16>, vector<32x128xf32> -> vector<32x128xf32>
    %11 = arith.addf %5, %10 : vector<32x128xf32>
    %12 = vector.extract_strided_slice %0 {offsets = [0, 2, 0], sizes = [2, 16, 72], strides = [1, 1, 1]} : vector<2x18x72xbf16> to vector<2x16x72xbf16>
    %13 = vector.shape_cast %12 : vector<2x16x72xbf16> to vector<32x72xbf16>
    %c2 = arith.constant 2 : index
    %c0_8 = arith.constant 0 : index
    %c0_9 = arith.constant 0 : index
    %14 = vector.load %arg2[%c2, %c0_8, %c0_9] : memref<3x72x128xbf16, #tpu.memory_space<vmem>>, vector<1x72x128xbf16>
    %15 = vector.shape_cast %14 : vector<1x72x128xbf16> to vector<72x128xbf16>
    %cst_10 = arith.constant dense<0.000000e+00> : vector<32x128xf32>
    %16 = tpu.matmul %13, %15, %cst_10 {dimension_numbers = #tpu.dot_dimension_numbers<[1], [0], [0], [1], [0, 0, 1, 1], [], []>} : vector<32x72xbf16>, vector<72x128xbf16>, vector<32x128xf32> -> vector<32x128xf32>
    %17 = arith.addf %11, %16 : vector<32x128xf32>
    %c0_11 = arith.constant 0 : index
    %c0_12 = arith.constant 0 : index
    %18 = vector.load %arg5[%c0_11, %c0_12] : memref<128x8xf32, #tpu.memory_space<vmem>>, vector<128x8xf32>
    %c0_13 = arith.constant 0 : index
    %c0_14 = arith.constant 0 : index
    %19 = vector.load %arg6[%c0_13, %c0_14] : memref<8x128xf32, #tpu.memory_space<vmem>>, vector<8x128xf32>
    %cst_15 = arith.constant dense<0.000000e+00> : vector<128xf32>
    %20 = vector.multi_reduction <add>, %17, %cst_15 [0] : vector<32x128xf32> to vector<128xf32>
    %21 = vector.shape_cast %20 : vector<128xf32> to vector<1x128xf32>
    %cst_16 = arith.constant dense<0.000000e+00> : vector<1x8xf32>
    %22 = tpu.matmul %21, %18, %cst_16 {dimension_numbers = #tpu.dot_dimension_numbers<[1], [0], [0], [1], [0, 0, 1, 1], [], []>} : vector<1x128xf32>, vector<128x8xf32>, vector<1x8xf32> -> vector<1x8xf32>
    %cst_17 = arith.constant 0.001953125 : f32
    %23 = vector.broadcast %cst_17 : f32 to vector<1x8xf32>
    %24 = arith.mulf %22, %23 : vector<1x8xf32>
    %cst_18 = arith.constant dense<0.000000e+00> : vector<1x128xf32>
    %25 = tpu.matmul %24, %19, %cst_18 {dimension_numbers = #tpu.dot_dimension_numbers<[1], [0], [0], [1], [0, 0, 1, 1], [], []>} : vector<1x8xf32>, vector<8x128xf32>, vector<1x128xf32> -> vector<1x128xf32>
    %26 = vector.broadcast %25 : vector<1x128xf32> to vector<32x128xf32>
    %27 = arith.subf %17, %26 : vector<32x128xf32>
    %28 = arith.mulf %27, %27 : vector<32x128xf32>
    %cst_19 = arith.constant dense<0.000000e+00> : vector<128xf32>
    %29 = vector.multi_reduction <add>, %28, %cst_19 [0] : vector<32x128xf32> to vector<128xf32>
    %30 = vector.shape_cast %29 : vector<128xf32> to vector<1x128xf32>
    %cst_20 = arith.constant dense<0.000000e+00> : vector<1x8xf32>
    %31 = tpu.matmul %30, %18, %cst_20 {dimension_numbers = #tpu.dot_dimension_numbers<[1], [0], [0], [1], [0, 0, 1, 1], [], []>} : vector<1x128xf32>, vector<128x8xf32>, vector<1x8xf32> -> vector<1x8xf32>
    %cst_21 = arith.constant 0.001953125 : f32
    %32 = vector.broadcast %cst_21 : f32 to vector<1x8xf32>
    %33 = arith.mulf %31, %32 : vector<1x8xf32>
    %c0_22 = arith.constant 0 : index
    %c0_23 = arith.constant 0 : index
    %34 = vector.load %arg3[%c0_22, %c0_23] : memref<1x8xf32, #tpu.memory_space<vmem>>, vector<1x8xf32>
    %cst_24 = arith.constant 9.99999974E-6 : f32
    %35 = vector.broadcast %cst_24 : f32 to vector<1x8xf32>
    %36 = arith.addf %33, %35 : vector<1x8xf32>
    %37 = math.rsqrt %36 : vector<1x8xf32>
    %38 = arith.mulf %34, %37 : vector<1x8xf32>
    %c0_25 = arith.constant 0 : index
    %c0_26 = arith.constant 0 : index
    %39 = vector.load %arg4[%c0_25, %c0_26] : memref<1x8xf32, #tpu.memory_space<vmem>>, vector<1x8xf32>
    %40 = arith.mulf %24, %38 : vector<1x8xf32>
    %41 = arith.subf %39, %40 : vector<1x8xf32>
    %cst_27 = arith.constant dense<0.000000e+00> : vector<1x128xf32>
    %42 = tpu.matmul %38, %19, %cst_27 {dimension_numbers = #tpu.dot_dimension_numbers<[1], [0], [0], [1], [0, 0, 1, 1], [], []>} : vector<1x8xf32>, vector<8x128xf32>, vector<1x128xf32> -> vector<1x128xf32>
    %cst_28 = arith.constant dense<0.000000e+00> : vector<1x128xf32>
    %43 = tpu.matmul %41, %19, %cst_28 {dimension_numbers = #tpu.dot_dimension_numbers<[1], [0], [0], [1], [0, 0, 1, 1], [], []>} : vector<1x8xf32>, vector<8x128xf32>, vector<1x128xf32> -> vector<1x128xf32>
    %44 = vector.broadcast %42 : vector<1x128xf32> to vector<32x128xf32>
    %45 = arith.mulf %17, %44 : vector<32x128xf32>
    %46 = vector.broadcast %43 : vector<1x128xf32> to vector<32x128xf32>
    %47 = arith.addf %45, %46 : vector<32x128xf32>
    %cst_29 = arith.constant 0.000000e+00 : f32
    %48 = vector.broadcast %cst_29 : f32 to vector<32x128xf32>
    %49 = arith.maximumf %47, %48 : vector<32x128xf32>
    %c0_30 = arith.constant 0 : index
    %c0_31 = arith.constant 0 : index
    %50 = vector.load %arg7[%c0_30, %c0_31] : memref<32x128xf32, #tpu.memory_space<vmem>>, vector<32x128xf32>
    tpu.vector_store %arg7[%c0_30, %c0_31], %49 {strides = array<i32>} : memref<32x128xf32, #tpu.memory_space<vmem>>, vector<32x128xf32>,
    return
  }
  func.func @transform_0(%arg0: i32) -> (i32, i32, i32) {
    %c0_i32 = arith.constant 0 : i32
    %c0_i32_0 = arith.constant 0 : i32
    %c0_i32_1 = arith.constant 0 : i32
    %c0_i32_2 = arith.constant 0 : i32
    return %c0_i32, %c0_i32_0, %c0_i32_1 : i32, i32, i32
  }
  func.func @transform_1(%arg0: i32) -> (i32, i32, i32) {
    %c0_i32 = arith.constant 0 : i32
    %c0_i32_0 = arith.constant 0 : i32
    %c0_i32_1 = arith.constant 0 : i32
    %c0_i32_2 = arith.constant 0 : i32
    return %c0_i32, %c0_i32_0, %c0_i32_1 : i32, i32, i32
  }
  func.func @transform_2(%arg0: i32) -> (i32, i32) {
    %c0_i32 = arith.constant 0 : i32
    %c0_i32_0 = arith.constant 0 : i32
    %c0_i32_1 = arith.constant 0 : i32
    return %c0_i32, %c0_i32_0 : i32, i32
  }
  func.func @transform_3(%arg0: i32) -> (i32, i32) {
    %c0_i32 = arith.constant 0 : i32
    %c0_i32_0 = arith.constant 0 : i32
    %c0_i32_1 = arith.constant 0 : i32
    return %c0_i32, %c0_i32_0 : i32, i32
  }
  func.func @transform_4(%arg0: i32) -> (i32, i32) {
    %c0_i32 = arith.constant 0 : i32
    %c0_i32_0 = arith.constant 0 : i32
    %c0_i32_1 = arith.constant 0 : i32
    return %c0_i32, %c0_i32_0 : i32, i32
  }
  func.func @transform_5(%arg0: i32) -> (i32, i32) {
    %c0_i32 = arith.constant 0 : i32
    %c0_i32_0 = arith.constant 0 : i32
    %c0_i32_1 = arith.constant 0 : i32
    return %c0_i32, %c0_i32_0 : i32, i32
  }
  func.func @transform_6(%arg0: i32) -> (i32, i32) {
    %c0_i32 = arith.constant 0 : i32
    %c0_i32_0 = arith.constant 0 : i32
    %c0_i32_1 = arith.constant 0 : i32
    return %c0_i32, %c0_i32_0 : i32, i32
  }
}

</mosaic_0001>

<bundles_post_ra>
// kernel: tpu_custom_call.1
= control target key start
LH: loop header
LB: loop body
LE: loop exit
PB: predicated region body
PF: predicated region fallthrough
CT: control target
= control target key end

     0   :  { %vm141_vm0 = vcmask 1043456   ;;  %vm231_vm1 = vcmask 1042432   ;;  %vm232_vm2 = vcmask 1046532   ;;  %vm40_vm3 = vsmask.f32 3328  ;;  %s885_s0 = inlined_call_operand.vmem [shape: bf16[2,18,72], index: 0, kind: input, shape index: {}]   ;;  %s886_s1 = inlined_call_operand.vmem [shape: bf16[3,72,128], index: 1, kind: input, shape index: {}]   ;;  %s887_s2 = inlined_call_operand.vmem [shape: f32[1,8], index: 2, kind: input, shape index: {}]   ;;  %s888_s3 = inlined_call_operand.vmem [shape: f32[1,8], index: 3, kind: input, shape index: {}]   ;;  %s889_s4 = inlined_call_operand.vmem [shape: f32[128,8], index: 4, kind: input, shape index: {}]   ;;  %s890_s5 = inlined_call_operand.vmem [shape: f32[8,128], index: 5, kind: input, shape index: {}]   ;;  %s891_s6 = inlined_call_operand.hbm [shape: f32[32,128], index: 6, kind: output, shape index: {}]  }
   0x1   :  { %v539_v0 = vld [vmem:[%s886_s1 + $0x44] sm:$0xf]  ;;  %v39_v1 = vld [vmem:[%s886_s1 + $0x20] sm:$0xf]  ;;  %v594_v4 = vld [vmem:[%s886_s1 + $0x68] sm:$0xf] }
   0x2   :  { %v124_v2 = vunpack.c.l.b16 %v539_v0  ;;  %v191_v3 = vunpack.c.l.b16 %v39_v1  ;;  %v281_v5 = vunpack.c.l.b16 %v594_v4  ;;  %v625_v9 = vld [vmem:[%s886_s1 + $0x3c] sm:$0xff]  ;;  %v26_v14 = vld [vmem:[%s885_s0 + $0x4] sm:$0xf]  ;;  %v27_v16 = vld [vmem:[%s885_s0 + $0x8] sm:$0x1] }
   0x3   :  { %v621_v10 = vld [vmem:[%s886_s1 + $0x18] sm:$0xff]  ;;  %v25_v13 = vld [vmem:[%s885_s0] sm:$0xf]  ;;  %v53_v19 = vshll.u32 %v26_v14, 16  ;;  %v57_v21 = vshrl.u32 %v26_v14, 16  ;;  %v63_v22 = vshll.u32 %v27_v16, 16  ;;  %vm734_vm5 = vmor %vm231_vm1, %vm232_vm2 }
   0x4   :  { %v129_v6 = vpack.c.b16 %v124_v2, %v124_v2  ;;  %v196_v7 = vpack.c.b16 %v191_v3, %v191_v3  ;;  %v286_v8 = vpack.c.b16 %v281_v5, %v281_v5  ;;  %v44_v17 = vshrl.u32 %v25_v13, 16  ;;  %v629_v20 = vld [vmem:[%s886_s1 + $0x60] sm:$0xff]  ;;  %v624_v27 = vld [vmem:[%s886_s1 + $0x34] sm:$0xff]  ;;  %v741_v35 = vld [vmem:[%s885_s0 + $0xc] sm:$0xf] }
   0x5   :  { %v47_v18 = vshll.u32 %v25_v13, 16  ;;  %v236_v23 = vrot.slane %v26_v14, 5  ;;  %vm41_vm4 = vsmask.f32 7440  ;;  %v55_v26 = vrot.slane %v53_v19, 5  ;;  %v620_v28 = vld [vmem:[%s886_s1 + $0x10] sm:$0xff] }
   0x6   :  { %v143_v11 = vsel %vm141_vm0, %v129_v6, 0  ;;  %v208_v12 = vsel %vm141_vm0, %v196_v7, 0  ;;  %v298_v15 = vsel %vm141_vm0, %v286_v8, 0  ;;  %v46_v24 = vrot.slane %v44_v17, 4 }
   0x7   :  { %148 = vmatpush.bf16.msra.mxu0 %v143_v11  ;;  %213 = vmatpush.bf16.msra.mxu1 %v208_v12  ;;  %v49_v25 = vrot.slane %v47_v18, 5  ;;  %v59_v29 = vrot.slane %v57_v21, 4  ;;  %v584_v31 = vrot.slane %v25_v13, 9  ;;  %v238_v33 = vrot.slane %v236_v23, 4 }
   0x8   :  { %303 = vmatpush.bf16.msra.mxu2 %v298_v15  ;;  %v239_v34 = vrot.slane %v27_v16, 5 }
   0x9   :  { %v50_v32 = vor.u32 %v49_v25, %v46_v24 }
   0xb   :  { %149 = vmatpush.bf16.msra.mxu0 %v625_v9  ;;  %214 = vmatpush.bf16.msra.mxu1 %v621_v10 }
   0xc   :  { %11 = vsyncpa [#allocation3], 0  ;;  %304 = vmatpush.bf16.msra.mxu2 %v629_v20  ;;  %v628_v36 = vld [vmem:[%s886_s1 + $0x58] sm:$0xff]  ;;  %v60_v38 = vor.u32 %v59_v29, %v55_v26  ;;  %v65_v39 = vrot.slane %v63_v22, 5  ;;  %v29_v40 = vld [vmem:[%s885_s0 + $0x10] sm:$0xf]  ;;  %v237_v43 = vsel %vm734_vm5, %v584_v31, %v236_v23  ;;  %v240_v49 = vsel %vm734_vm5, %v238_v33, %v239_v34 }
   0xd   :  { %vm748_vm6 = vmor %vm40_vm3, %vm41_vm4  ;;  %v51_v41 = vrot.slane %v50_v32, 4  ;;  %v68_v44 = vshrl.u32 %v741_v35, 16  ;;  %v71_v45 = vshll.u32 %v741_v35, 16  ;;  %v623_v46 = vld [vmem:[%s886_s1 + $0x2c] sm:$0xff]  ;;  %v77_v50 = vshll.u32 %v29_v40, 16  ;;  %v622_v58 = vld [vmem:[%s886_s1 + $0x24] sm:$0xff] }
   0xe   :  { %v61_v42 = vrot.slane %v60_v38, 4  ;;  %v619_v47 = vld [vmem:[%s886_s1 + $0x8] sm:$0xff]  ;;  %v81_v51 = vshrl.u32 %v29_v40, 16  ;;  %v627_v52 = vld [vmem:[%s886_s1 + $0x50] sm:$0xff]  ;;  %v258_v56 = vunpack.c.l.b16 %v237_v43  ;;  %v259_v57 = vunpack.c.l.b16 %v240_v49  ;;  %v618_v59 = vld [vmem:[%s886_s1] sm:$0xff]  ;;  %s519_s29 = sshll.u32 %s891_s6, 4  ;;  %s520_s29 = int_to_ptr.hbm [resolvable:$true] %s519_s29 }
   0xf   :  { %150 = vmatpush.bf16.msra.mxu0 %v624_v27  ;;  %215 = vmatpush.bf16.msra.mxu1 %v620_v28  ;;  %v56_v48 = vsel %vm748_vm6, %v51_v41, %v55_v26  ;;  %v70_v60 = vrot.slane %v68_v44, 4  ;;  %v73_v61 = vrot.slane %v71_v45, 5  ;;  %v79_v62 = vrot.slane %v77_v50, 5  ;;  %v626_v0 = vld [vmem:[%s886_s1 + $0x48] sm:$0xff]  ;;  %v30_v1 = vld [vmem:[%s885_s0 + $0x14] sm:$0x1] }
  0x10   :  { %305 = vmatpush.bf16.msra.mxu2 %v628_v36  ;;  %v66_v53 = vsel %vm748_vm6, %v61_v42, %v65_v39  ;;  %v101_v54 = vunpack.c.l.b16 %v56_v48  ;;  %v83_v63 = vrot.slane %v81_v51, 4  ;;  %vm134_vm7 = vcmask 588800   ;;  %v616_v3 = vld [vmem:[%s885_s0] sm:$0xff]  ;;  %v617_v24 = vld [vmem:[%s885_s0 + $0xc] sm:$0xff]  ;;  %v338_v26 = vld [vmem:[%s889_s4 + $0x78] sm:$0xff]  ;;  %s662_s30 = smov 128  }
  0x11   :  { %v102_v55 = vunpack.c.l.b16 %v66_v53  ;;  %v262_v4 = vpack.c.b16 %v259_v57, %v258_v56  ;;  %v74_v5 = vor.u32 %v73_v61, %v70_v60  ;;  %v87_v7 = vshll.u32 %v30_v1, 16  ;;  %349 = vmatpush.msra.mxu3 %v338_v26  ;;  %v337_v27 = vld [vmem:[%s889_s4 + $0x70] sm:$0xff]  ;;  %v336_v28 = vld [vmem:[%s889_s4 + $0x68] sm:$0xff]  ;;  %v335_v29 = vld [vmem:[%s889_s4 + $0x60] sm:$0xff]  ;;  %s663_s7 = smov 8  }
  0x12   :  { %v84_v6 = vor.u32 %v83_v63, %v79_v62  ;;  %v243_v8 = vrot.slane %v29_v40, 5  ;;  %v585_v12 = vrot.slane %v741_v35, 9  ;;  %v246_v14 = vrot.slane %v30_v1, 5  ;;  %v334_v30 = vld [vmem:[%s889_s4 + $0x58] sm:$0xff]  ;;  %v333_v31 = vld [vmem:[%s889_s4 + $0x50] sm:$0xff]  ;;  %v332_v32 = vld [vmem:[%s889_s4 + $0x48] sm:$0xff] }
  0x13   :  { %151 = vmatpush.bf16.msra.mxu0 %v623_v46  ;;  %216 = vmatpush.bf16.msra.mxu1 %v619_v47  ;;  %v105_v2 = vpack.c.b16 %v102_v55, %v101_v54  ;;  %v75_v9 = vrot.slane %v74_v5, 4  ;;  %v89_v11 = vrot.slane %v87_v7, 5  ;;  %v331_v33 = vld [vmem:[%s889_s4 + $0x40] sm:$0xff]  ;;  %v330_v36 = vld [vmem:[%s889_s4 + $0x38] sm:$0xff]  ;;  %v329_v37 = vld [vmem:[%s889_s4 + $0x30] sm:$0xff]  ;;  %vm370_vm8 = vcmask 64512  }
  0x14   :  { %306 = vmatpush.bf16.msra.mxu2 %v627_v52  ;;  %v85_v10 = vrot.slane %v84_v6, 4  ;;  %v245_v13 = vrot.slane %v243_v8, 4  ;;  %v244_v17 = vsel %vm734_vm5, %v585_v12, %v243_v8  ;;  %350 = vmatpush.msra.mxu3 %v337_v27  ;;  %v328_v38 = vld [vmem:[%s889_s4 + $0x28] sm:$0xff]  ;;  %v327_v39 = vld [vmem:[%s889_s4 + $0x20] sm:$0xff]  ;;  %v326_v40 = vld [vmem:[%s889_s4 + $0x18] sm:$0xff] }
  0x15   :  { %v80_v15 = vsel %vm748_vm6, %v75_v9, %v79_v62  ;;  %v260_v21 = vunpack.c.l.b16 %v244_v17  ;;  %v325_v44 = vld [vmem:[%s889_s4 + $0x10] sm:$0xff]  ;;  %v324_v45 = vld [vmem:[%s889_s4 + $0x8] sm:$0xff]  ;;  %v323_v46 = vld [vmem:[%s889_s4] sm:$0xff] }
  0x16   :  { %v90_v16 = vsel %vm748_vm6, %v85_v10, %v89_v11  ;;  %v247_v18 = vsel %vm734_vm5, %v245_v13, %v246_v14  ;;  %v103_v19 = vunpack.c.l.b16 %v80_v15  ;;  %351 = vmatpush.msra.mxu3 %v336_v28  ;;  %v339_v48 = vld [vmem:[%s890_s5] sm:$0xff] }
  0x17   :  { %152 = vmatpush.bf16.msra.mxu0 %v622_v58  ;;  %217 = vmatpush.bf16.msra.mxu1 %v618_v59  ;;  %v104_v20 = vunpack.c.l.b16 %v90_v16  ;;  %v261_v22 = vunpack.c.l.b16 %v247_v18 }
  0x18   :  { %307 = vmatpush.bf16.msra.mxu2 %v626_v0  ;;  %352 = vmatpush.msra.mxu3 %v335_v29 }
  0x19   :  { %v106_v23 = vpack.c.b16 %v104_v20, %v103_v19  ;;  %v263_v25 = vpack.c.b16 %v261_v22, %v260_v21 }
  0x1a   :  { %556 = vmatmul.msk.bf16.vlgmr.msra.gmra.mxu0 %vm134_vm7, %v105_v2  ;;  %582 = vmatmul.msk.bf16.vlgmr.msra.gmra.mxu1 %vm134_vm7, %v616_v3 }
  0x1b   :  { %611 = vmatmul.msk.bf16.vlgmr.msra.gmra.mxu2 %vm134_vm7, %v262_v4  ;;  %412 = vmatpush.msrb.mxu0 %v338_v26 }
  0x1c   :  { %353 = vmatpush.msra.mxu3 %v334_v30  ;;  %490 = vmatpush.msrb.mxu1 %v339_v48 }
  0x1d   :  { %413 = vmatpush.msrb.mxu0 %v337_v27 }
  0x1e   :  { %354 = vmatpush.msra.mxu3 %v333_v31 }
  0x1f   :  { %414 = vmatpush.msrb.mxu0 %v336_v28 }
  0x20   :  { %355 = vmatpush.msra.mxu3 %v332_v32 }
  0x21   :  { %415 = vmatpush.msrb.mxu0 %v335_v29 }
  0x22   :  { %356 = vmatpush.msra.mxu3 %v331_v33 }
  0x23   :  { %416 = vmatpush.msrb.mxu0 %v334_v30 }
  0x24   :  { %357 = vmatpush.msra.mxu3 %v330_v36 }
  0x25   :  { %417 = vmatpush.msrb.mxu0 %v333_v31 }
  0x26   :  { %358 = vmatpush.msra.mxu3 %v329_v37 }
  0x27   :  { %418 = vmatpush.msrb.mxu0 %v332_v32 }
  0x28   :  { %359 = vmatpush.msra.mxu3 %v328_v38 }
  0x29   :  { %419 = vmatpush.msrb.mxu0 %v331_v33 }
  0x2a   :  { %557 = vmatmul.msk.bf16.gmra.mxu0 %vm134_vm7, %v106_v23  ;;  %583 = vmatmul.msk.bf16.gmra.mxu1 %vm134_vm7, %v617_v24 }
  0x2b   :  { %612 = vmatmul.msk.bf16.gmra.mxu2 %vm134_vm7, %v263_v25  ;;  %420 = vmatpush.msrb.mxu0 %v330_v36 }
  0x2c   :  { %360 = vmatpush.msra.mxu3 %v327_v39 }
  0x2d   :  { %421 = vmatpush.msrb.mxu0 %v329_v37  ;;  %v433_v37 = vld [vmem:[%s887_s2] sm:$0x1]  ;;  %s661_s2 = smov [#allocation2]  }
  0x2e   :  { %361 = vmatpush.msra.mxu3 %v326_v40 }
  0x2f   :  { %422 = vmatpush.msrb.mxu0 %v328_v38 }
  0x30   :  { %362 = vmatpush.msra.mxu3 %v325_v44 }
  0x31   :  { %423 = vmatpush.msrb.mxu0 %v327_v39 }
  0x32   :  { %363 = vmatpush.msra.mxu3 %v324_v45 }
  0x33   :  { %424 = vmatpush.msrb.mxu0 %v326_v40 }
  0x34   :  { %364 = vmatpush.msra.mxu3 %v323_v46 }
  0x35   :  { %425 = vmatpush.msrb.mxu0 %v325_v44 }
  0x36   :  { %389 = vmatpush.msrb.mxu3 %v339_v48 }
  0x37   :  { %426 = vmatpush.msrb.mxu0 %v324_v45 }
  0x39   :  { %427 = vmatpush.msrb.mxu0 %v323_v46 }
  0x97   :  { %v154_v34 = vpop.f32.mrf.mxu0  ;;  %v219_v35 = vpop.f32.mrf.mxu1 }
  0x98   :  { %v220_v52 = vadd.f32 %v219_v35, %v154_v34 }
  0x9e   :  { %v309_v41 = vpop.f32.mrf.mxu2 }
  0x9f   :  { %v156_v42 = vpop.f32.mrf.mxu0  ;;  %v221_v43 = vpop.f32.mrf.mxu1  ;;  %v860_v58 = vadd.f32 %v309_v41, %v220_v52  ;;  %v446_v41 = vld [vmem:[%s888_s3] sm:$0x1]  ;;  %s517_s3 = sshll.u32 %s661_s2, 4  ;;  %s518_s3 = int_to_ptr.vmem [resolvable:$true] %s517_s3 }
  0xa0   :  { %v222_v53 = vadd.f32 %v221_v43, %v156_v42 }
  0xa6   :  { %v311_v47 = vpop.f32.mrf.mxu2 }
  0xa7   :  { %v159_v49 = vpop.f32.mrf.mxu0  ;;  %v224_v50 = vpop.f32.mrf.mxu1  ;;  %v858_v55 = vadd.f32 %v311_v47, %v222_v53 }
  0xa8   :  { %v225_v54 = vadd.f32 %v224_v50, %v159_v49 }
  0xa9   :  { %v340_v60 = vadd.f32 %v858_v55, %v860_v58 }
  0xae   :  { %v314_v51 = vpop.f32.mrf.mxu2 }
  0xaf   :  { %v161_v56 = vpop.f32.mrf.mxu0  ;;  %v226_v57 = vpop.f32.mrf.mxu1  ;;  %v862_v59 = vadd.f32 %v314_v51, %v225_v54 }
  0xb0   :  { %v227_v61 = vadd.f32 %v226_v57, %v161_v56 }
  0xb1   :  { %v341_v63 = vadd.f32 %v340_v60, %v862_v59 }
  0xb6   :  { %v316_v62 = vpop.f32.mrf.mxu2 }
  0xb7   :  { %v322_v0 = vadd.f32 %v316_v62, %v227_v61 }
  0xb9   :  { %v342_v1 = vadd.f32 %v341_v63, %v322_v0 }
  0xbb   :  { %v343_v2 = vrot.slane %v342_v1, 4 }
  0xbd   :  { %v344_v3 = vadd.f32 %v343_v2, %v342_v1 }
  0xbf   :  { %v345_v4 = vrot.slane %v344_v3, 2 }
  0xc1   :  { %v346_v5 = vadd.f32 %v345_v4, %v344_v3 }
  0xc3   :  { %v347_v6 = vrot.slane %v346_v5, 1 }
  0xc5   :  { %v348_v7 = vadd.f32 %v347_v6, %v346_v5 }
  0xc7   :  { %365 = vmatmul.f32.vlgmr.msra.gmra.mxu3 %v348_v7 }
  0xc8   :  { %467 = vmatpush.msra.mxu3 %v339_v48 }
 0x14a   :  { %v366_v8 = vpop.f32.mrf.mxu3 }
 0x14b   :  { %v369_v9 = vmul.f32 0.001953125, %v366_v8 }
 0x14d   :  { %613 = vmatmul.msk.f32.vlgmr.msrb.gmra.mxu3 %vm370_vm8, %v369_v9 }
 0x1d0   :  { %v391_v10 = vpop.f32.mrf.mxu3 }
 0x1d1   :  { %v394_v11 = vperm.slane %v391_v10, 0 }
 0x1d3   :  { %v395_v12 = vsub.f32 %v860_v58, %v394_v11  ;;  %v396_v13 = vsub.f32 %v858_v55, %v394_v11  ;;  %v397_v14 = vsub.f32 %v862_v59, %v394_v11  ;;  %v398_v15 = vsub.f32 %v322_v0, %v394_v11 }
 0x1d5   :  { %v399_v16 = vmul.f32 %v395_v12, %v395_v12  ;;  %v400_v17 = vmul.f32 %v396_v13, %v396_v13  ;;  %v401_v18 = vmul.f32 %v397_v14, %v397_v14  ;;  %v402_v20 = vmul.f32 %v398_v15, %v398_v15 }
 0x1d7   :  { %v403_v19 = vadd.f32 %v400_v17, %v399_v16 }
 0x1d9   :  { %v404_v21 = vadd.f32 %v403_v19, %v401_v18 }
 0x1db   :  { %v405_v22 = vadd.f32 %v404_v21, %v402_v20 }
 0x1dd   :  { %v406_v23 = vrot.slane %v405_v22, 4 }
 0x1df   :  { %v407_v24 = vadd.f32 %v406_v23, %v405_v22 }
 0x1e1   :  { %v408_v25 = vrot.slane %v407_v24, 2 }
 0x1e3   :  { %v409_v26 = vadd.f32 %v408_v25, %v407_v24 }
 0x1e5   :  { %v410_v27 = vrot.slane %v409_v26, 1 }
 0x1e7   :  { %v411_v28 = vadd.f32 %v410_v27, %v409_v26 }
 0x1e9   :  { %428 = vmatmul.f32.vlgmr.msrb.gmra.mxu0 %v411_v28 }
 0x266   :  { %v429_v29 = vpop.f32.mrf.mxu0 }
 0x267   :  { %v432_v30 = vmul.f32 0.001953125, %v429_v29 }
 0x269   :  { %v434_v31 = vadd.f32 1e-05, %v432_v30 }
 0x26b   :  { %633 = vrsqrt.f32 %v434_v31  ;;  %vm441_vm10 = vweird.f32 %v434_v31 }
 0x271   :  { %v634_v32 = vpop.eup %633 }
 0x272   :  { %v436_v33 = vmul.f32 %v634_v32, %v434_v31  ;;  %vm442_vm9 = vweird.f32 %v634_v32 }
 0x273   :  { %vm443_vm11 = vmor %vm441_vm10, %vm442_vm9 }
 0x274   :  { %v437_v34 = vmul.f32 %v634_v32, %v436_v33 }
 0x276   :  { %v438_v35 = vmul.f32 0.5, %v437_v34 }
 0x278   :  { %v439_v36 = vsub.f32 1.5, %v438_v35 }
 0x27a   :  { %v440_v38 = vmul.f32 %v634_v32, %v439_v36 }
 0x27c   :  { %v444_v39 = vsel %vm443_vm11, %v634_v32, %v440_v38 }
 0x27d   :  { %v445_v40 = vmul.f32 %v444_v39, %v433_v37 }
 0x27f   :  { %614 = vmatmul.msk.f32.vlgmr.msra.gmra.mxu3 %vm370_vm8, %v445_v40  ;;  %v447_v42 = vmul.f32 %v445_v40, %v369_v9 }
 0x281   :  { %v448_v43 = vsub.f32 %v446_v41, %v447_v42 }
 0x283   :  { %615 = vmatmul.msk.f32.vlgmr.msrb.gmra.mxu1 %vm370_vm8, %v448_v43 }
 0x300   :  { %v492_v44 = vpop.f32.mrf.mxu1 }
 0x301   :  { %v500_v47 = vperm.slane %v492_v44, 0 }
 0x302   :  { %v469_v45 = vpop.f32.mrf.mxu3 }
 0x303   :  { %v495_v46 = vperm.slane %v469_v45, 0 }
 0x305   :  { %v496_v48 = vmul.f32 %v495_v46, %v860_v58  ;;  %v497_v49 = vmul.f32 %v495_v46, %v858_v55  ;;  %v498_v50 = vmul.f32 %v495_v46, %v862_v59  ;;  %v499_v51 = vmul.f32 %v495_v46, %v322_v0 }
 0x307   :  { %v501_v52 = vadd.f32 %v500_v47, %v496_v48  ;;  %v502_v53 = vadd.f32 %v500_v47, %v497_v49  ;;  %v503_v54 = vadd.f32 %v500_v47, %v498_v50  ;;  %v504_v56 = vadd.f32 %v500_v47, %v499_v51 }
 0x309   :  { %v505_v57 = vmax.f32 %v501_v52, 0.0  ;;  %v506_v60 = vmax.f32 %v502_v53, 0.0  ;;  %v507_v61 = vmax.f32 %v503_v54, 0.0  ;;  %v508_v62 = vmax.f32 %v504_v56, 0.0 }
 0x30b   :  { %509 = vst [vmem:[#allocation2] sm:$0xff] %v505_v57 }
 0x30c   :  { %510 = vst [vmem:[#allocation2 + $0x8] sm:$0xff] %v506_v60 }
 0x30d   :  { %511 = vst [vmem:[#allocation2 + $0x10] sm:$0xff] %v507_v61 }
 0x30e   :  { %512 = vst [vmem:[#allocation2 + $0x18] sm:$0xff] %v508_v62 }
 0x30f   :  { %525 = dma.vmem_to_hbm [thread:$0]  %s518_s3, 512, %s520_s29, [#allocation3], %s662_s30, %s662_s30, %s663_s7  }
 0x310   :  { %659 = dma.done.wait [#allocation3], 512  }
 0x311   :  { %660 = vsyncadd [#allocation3], 4294966784 }
 0x312   :  { %530 = vsyncpa [#allocation3], 1 }

</bundles_post_ra>
